<compile_context>
chip_gen: v6e
topology: v6e:2x2x1
jax: 0.10.0
libtpu: 0.0.40
codegen_flags: <defaults>
</compile_context>

<pallas_src>
import jax
import jax.numpy as jnp
from jax.experimental import pallas as pl
from jax.experimental.pallas import tpu as pltpu

# Hidden dims padded to lane-friendly sizes (100 -> 128, 500 -> 512).
H1, H2, H3 = 128, 512, 128
MAX_TB = 2048   # per-step working set ~7 MB at 2048; safe on v5e/v6e/v7x


def _round_up(x, m):
    return ((x + m - 1) // m) * m


def _cdiv(a, b):
    return (a + b - 1) // b


def mlp_kernel(x_ref, w1_ref, b1_ref, w2_ref, b2_ref,
               w3_ref, b3_ref, w4_ref, b4_ref, out_ref):
    # Layer 1 (normalization already folded into w1/b1 host-side).
    h = jnp.dot(x_ref[...], w1_ref[...],
                preferred_element_type=jnp.float32) + b1_ref[...]
    h = jnp.maximum(h, 0.0)

    # Linear(128, 512) + ReLU  (operands cast to w2 dtype -> bf16 MXU path
    # when prepare_params(mxu_dtype=bf16) was used; always f32 accumulate).
    h = jnp.dot(h.astype(w2_ref.dtype), w2_ref[...],
                preferred_element_type=jnp.float32) + b2_ref[...]
    h = jnp.maximum(h, 0.0)

    # Linear(512, 128) + ReLU
    h = jnp.dot(h.astype(w3_ref.dtype), w3_ref[...],
                preferred_element_type=jnp.float32) + b3_ref[...]
    h = jnp.maximum(h, 0.0)

    # Final Linear(128, 1): VPU multiply + lane reduce instead of an N=1 MXU
    # matmul; output stored lane-dense with batch on the lane axis.
    y = jnp.sum(h * w4_ref[...], axis=-1)                      # (TB,)
    out_ref[...] = (y[None, :] + b4_ref[...]).astype(out_ref.dtype)


def prepare_params(p, *, mxu_dtype=jnp.float32):
    """Fold normalization into layer 1, pad hidden dims, optionally cast the
    two big-matmul weights (w2/w3) to bf16 for the MXU.

    Zero padding is mathematically inert: padded weight rows/cols and padded
    bias lanes are zero, so padded lanes stay exactly zero through the ReLUs.
    """
    n_in = p["w1"].shape[0]
    n_out = p["w4"].shape[1]
    assert n_out == 1, "fused kernel specializes the final layer to n_out == 1"

    mean = p["mean"].astype(jnp.float32)              # (1, n_in)
    inv_std = (1.0 / p["std"]).astype(jnp.float32)    # (1, n_in)

    # (x - mean) * inv_std @ w1 + b1  ==  x @ (inv_std^T * w1) + (b1 - (mean*inv_std) @ w1)
    w1_folded = inv_std.reshape(n_in, 1) * p["w1"]
    b1_folded = p["b1"] - (mean * inv_std) @ p["w1"]

    def pad2(a, rows, cols, dtype=jnp.float32):
        a = jnp.pad(a, ((0, rows - a.shape[0]), (0, cols - a.shape[1])))
        return a.astype(dtype)

    return {
        "w1": pad2(w1_folded, n_in, H1),
        "b1": pad2(b1_folded, 1, H1),
        "w2": pad2(p["w2"], H1, H2, mxu_dtype),
        "b2": pad2(p["b2"], 1, H2),
        "w3": pad2(p["w3"], H2, H3, mxu_dtype),
        "b3": pad2(p["b3"], 1, H3),
        "w4_row": pad2(p["w4"][:, :1].T, 1, H3),   # (1, H3) row vector
        "b4": p["b4"][:, :1].astype(jnp.float32),  # (1, 1)
    }


def mlp_forward(x, q, *, tb=None):
    """x: (batch, n_in) f32. q: prepared (padded/folded) params."""
    batch, n_in = x.shape

    if tb is None:
        if batch < 256:
            tb = batch                                  # single grid step
        else:
            # >= 2 steps so v7x megacore shards the batch axis across both
            # TensorCores; cap at MAX_TB so the per-step working set stays
            # inside every generation's scoped-VMEM budget.
            n_steps = max(2, _cdiv(batch, MAX_TB))
            tb = _round_up(_cdiv(batch, n_steps), 128)
    if tb >= batch:
        # Whole batch in one step: full-dim blocks are exempt from the
        # (8,128) divisibility rule, so only round to the sublane width.
        tb = _round_up(batch, 8)
    else:
        tb = _round_up(tb, 128)
    batch_p = _round_up(batch, tb)
    x_p = jnp.pad(x, ((0, batch_p - batch), (0, 0))) if batch_p != batch else x

    grid = (batch_p // tb,)
    const2 = lambda i: (0, 0)   # params: fetched once, VMEM-resident
    param_order = ("w1", "b1", "w2", "b2", "w3", "b3", "w4_row", "b4")
    in_specs = [pl.BlockSpec((tb, n_in), lambda i: (i, 0))]           # x: batch-tiled
    in_specs += [pl.BlockSpec(q[k].shape, const2) for k in param_order]
    # Lane-dense output: batch on the lane axis, (1, TB) blocks.
    out_specs = pl.BlockSpec((1, tb), lambda i: (0, i))

    flops = 2 * batch_p * (n_in * H1 + H1 * H2 + H2 * H3 + H3 * 1)
    param_bytes = sum(int(q[k].size) * q[k].dtype.itemsize for k in param_order)
    bytes_accessed = int(x_p.size) * 4 + param_bytes + batch_p * 4

    out = pl.pallas_call(
        mlp_kernel,
        out_shape=jax.ShapeDtypeStruct((1, batch_p), jnp.float32),
        grid=grid,
        in_specs=in_specs,
        out_specs=out_specs,
        compiler_params=pltpu.CompilerParams(
            dimension_semantics=("parallel",),
            vmem_limit_bytes=32 * 1024 * 1024),
        cost_estimate=pl.CostEstimate(
            flops=flops, transcendentals=0, bytes_accessed=bytes_accessed),
    )(x_p, *(q[k] for k in param_order))

    # Flatten on (batch, 1) is a no-op; return (batch, n_out).
    return out[0, :batch].reshape(batch, 1)


def init_params(key, n_in, n_out=1):
    """Deterministic synthetic init matching PyTorch layer shapes.

    PyTorch Linear weight is (out, in); we store the transpose (in, out)."""
    dims = [(n_in, 100), (100, 500), (500, 100), (100, n_out)]
    params = {}
    keys = jax.random.split(key, 2 * len(dims) + 2)
    for i, (din, dout) in enumerate(dims):
        bound = 1.0 / jnp.sqrt(din)
        params[f"w{i+1}"] = jax.random.uniform(
            keys[2 * i], (din, dout), jnp.float32, -bound, bound)
        params[f"b{i+1}"] = jax.random.uniform(
            keys[2 * i + 1], (1, dout), jnp.float32, -bound, bound)
    # data_train_mean / data_train_std, viewed as (-1, n_in) -> (1, n_in)
    params["mean"] = jax.random.normal(keys[-2], (1, n_in), jnp.float32)
    params["std"] = jax.random.uniform(keys[-1], (1, n_in), jnp.float32, 0.5, 1.5)
    return params


def mlp_reference(x, p):
    h = (x - p["mean"]) / p["std"]
    h = jnp.maximum(h @ p["w1"] + p["b1"], 0.0)
    h = jnp.maximum(h @ p["w2"] + p["b2"], 0.0)
    h = jnp.maximum(h @ p["w3"] + p["b3"], 0.0)
    return h @ p["w4"] + p["b4"]


if __name__ == "__main__":
    key = jax.random.PRNGKey(0)
    n_in, n_out, batch = 16, 1, 8

    pkey, xkey = jax.random.split(key)
    params = init_params(pkey, n_in, n_out)
    x = jax.random.normal(xkey, (batch, n_in), jnp.float32)
    ref = mlp_reference(x, params)

    # f32 MXU path (bit-accurate to ~1e-4 vs. the reference).
    prepped = prepare_params(params)
    out = jax.block_until_ready(mlp_forward(x, prepped))
    assert out.shape == (batch, n_out)
    assert jnp.allclose(out, ref, atol=2e-4, rtol=2e-4), \
        float(jnp.max(jnp.abs(out - ref)))

    # bf16-operand path for the two dominant matmuls (v6e/v7x MXU lever),
    # f32 accumulation; looser accuracy budget.
    prepped_bf16 = prepare_params(params, mxu_dtype=jnp.bfloat16)
    out_bf16 = jax.block_until_ready(mlp_forward(x, prepped_bf16))
    assert jnp.allclose(out_bf16, ref, atol=5e-2, rtol=5e-2), \
        float(jnp.max(jnp.abs(out_bf16 - ref)))

    print("KERNEL_OK")
</pallas_src>

<mosaic_0001>
module attributes {stable_mosaic.version = 11 : i64} {
  func.func @mlp_kernel(%arg0: i32, %arg1: memref<8x16xf32, #tpu.memory_space<vmem>>, %arg2: memref<16x128xf32, #tpu.memory_space<vmem>>, %arg3: memref<1x128xf32, #tpu.memory_space<vmem>>, %arg4: memref<128x512xf32, #tpu.memory_space<vmem>>, %arg5: memref<1x512xf32, #tpu.memory_space<vmem>>, %arg6: memref<512x128xf32, #tpu.memory_space<vmem>>, %arg7: memref<1x128xf32, #tpu.memory_space<vmem>>, %arg8: memref<1x128xf32, #tpu.memory_space<vmem>>, %arg9: memref<1x1xf32, #tpu.memory_space<vmem>>, %arg10: memref<1x8xf32, #tpu.memory_space<vmem>>) attributes {dimension_semantics = [#tpu.dimension_semantics<parallel>], iteration_bounds = array<i64: 1>, scalar_prefetch = 0 : i64, scratch_operands = 0 : i64, tpu.core_type = #tpu.core_type<tc>, window_params = [{transform_indices = @transform_0, window_bounds = array<i64: 8, 16>}, {pipeline_mode = #tpu.pipeline_mode<synchronous>, transform_indices = @transform_1, window_bounds = array<i64: 16, 128>}, {pipeline_mode = #tpu.pipeline_mode<synchronous>, transform_indices = @transform_2, window_bounds = array<i64: 1, 128>}, {pipeline_mode = #tpu.pipeline_mode<synchronous>, transform_indices = @transform_3, window_bounds = array<i64: 128, 512>}, {pipeline_mode = #tpu.pipeline_mode<synchronous>, transform_indices = @transform_4, window_bounds = array<i64: 1, 512>}, {pipeline_mode = #tpu.pipeline_mode<synchronous>, transform_indices = @transform_5, window_bounds = array<i64: 512, 128>}, {pipeline_mode = #tpu.pipeline_mode<synchronous>, transform_indices = @transform_6, window_bounds = array<i64: 1, 128>}, {pipeline_mode = #tpu.pipeline_mode<synchronous>, transform_indices = @transform_7, window_bounds = array<i64: 1, 128>}, {pipeline_mode = #tpu.pipeline_mode<synchronous>, transform_indices = @transform_8, window_bounds = array<i64: 1, 1>}, {transform_indices = @transform_9, window_bounds = array<i64: 1, 8>}]} {
    %c0 = arith.constant 0 : index
    %c0_0 = arith.constant 0 : index
    %0 = vector.load %arg1[%c0, %c0_0] : memref<8x16xf32, #tpu.memory_space<vmem>>, vector<8x16xf32>
    %c0_1 = arith.constant 0 : index
    %c0_2 = arith.constant 0 : index
    %1 = vector.load %arg2[%c0_1, %c0_2] : memref<16x128xf32, #tpu.memory_space<vmem>>, vector<16x128xf32>
    %cst = arith.constant dense<0.000000e+00> : vector<8x128xf32>
    %2 = tpu.matmul %0, %1, %cst {dimension_numbers = #tpu.dot_dimension_numbers<[1], [0], [0], [1], [0, 0, 1, 1], [], []>} : vector<8x16xf32>, vector<16x128xf32>, vector<8x128xf32> -> vector<8x128xf32>
    %c0_3 = arith.constant 0 : index
    %c0_4 = arith.constant 0 : index
    %3 = vector.load %arg3[%c0_3, %c0_4] : memref<1x128xf32, #tpu.memory_space<vmem>>, vector<1x128xf32>
    %4 = vector.broadcast %3 : vector<1x128xf32> to vector<8x128xf32>
    %5 = arith.addf %2, %4 : vector<8x128xf32>
    %cst_5 = arith.constant 0.000000e+00 : f32
    %6 = vector.broadcast %cst_5 : f32 to vector<8x128xf32>
    %7 = arith.maximumf %5, %6 : vector<8x128xf32>
    %c0_6 = arith.constant 0 : index
    %c0_7 = arith.constant 0 : index
    %8 = vector.load %arg4[%c0_6, %c0_7] : memref<128x512xf32, #tpu.memory_space<vmem>>, vector<128x512xf32>
    %cst_8 = arith.constant dense<0.000000e+00> : vector<8x512xf32>
    %9 = tpu.matmul %7, %8, %cst_8 {dimension_numbers = #tpu.dot_dimension_numbers<[1], [0], [0], [1], [0, 0, 1, 1], [], []>} : vector<8x128xf32>, vector<128x512xf32>, vector<8x512xf32> -> vector<8x512xf32>
    %c0_9 = arith.constant 0 : index
    %c0_10 = arith.constant 0 : index
    %10 = vector.load %arg5[%c0_9, %c0_10] : memref<1x512xf32, #tpu.memory_space<vmem>>, vector<1x512xf32>
    %11 = vector.broadcast %10 : vector<1x512xf32> to vector<8x512xf32>
    %12 = arith.addf %9, %11 : vector<8x512xf32>
    %cst_11 = arith.constant 0.000000e+00 : f32
    %13 = vector.broadcast %cst_11 : f32 to vector<8x512xf32>
    %14 = arith.maximumf %12, %13 : vector<8x512xf32>
    %c0_12 = arith.constant 0 : index
    %c0_13 = arith.constant 0 : index
    %15 = vector.load %arg6[%c0_12, %c0_13] : memref<512x128xf32, #tpu.memory_space<vmem>>, vector<512x128xf32>
    %cst_14 = arith.constant dense<0.000000e+00> : vector<8x128xf32>
    %16 = tpu.matmul %14, %15, %cst_14 {dimension_numbers = #tpu.dot_dimension_numbers<[1], [0], [0], [1], [0, 0, 1, 1], [], []>} : vector<8x512xf32>, vector<512x128xf32>, vector<8x128xf32> -> vector<8x128xf32>
    %c0_15 = arith.constant 0 : index
    %c0_16 = arith.constant 0 : index
    %17 = vector.load %arg7[%c0_15, %c0_16] : memref<1x128xf32, #tpu.memory_space<vmem>>, vector<1x128xf32>
    %18 = vector.broadcast %17 : vector<1x128xf32> to vector<8x128xf32>
    %19 = arith.addf %16, %18 : vector<8x128xf32>
    %cst_17 = arith.constant 0.000000e+00 : f32
    %20 = vector.broadcast %cst_17 : f32 to vector<8x128xf32>
    %21 = arith.maximumf %19, %20 : vector<8x128xf32>
    %c0_18 = arith.constant 0 : index
    %c0_19 = arith.constant 0 : index
    %22 = vector.load %arg8[%c0_18, %c0_19] : memref<1x128xf32, #tpu.memory_space<vmem>>, vector<1x128xf32>
    %23 = vector.broadcast %22 : vector<1x128xf32> to vector<8x128xf32>
    %24 = arith.mulf %21, %23 : vector<8x128xf32>
    %cst_20 = arith.constant dense<0.000000e+00> : vector<8xf32>
    %25 = vector.multi_reduction <add>, %24, %cst_20 [1] : vector<8x128xf32> to vector<8xf32>
    %26 = vector.shape_cast %25 : vector<8xf32> to vector<1x8xf32>
    %c0_21 = arith.constant 0 : index
    %c0_22 = arith.constant 0 : index
    %27 = vector.load %arg9[%c0_21, %c0_22] : memref<1x1xf32, #tpu.memory_space<vmem>>, vector<1x1xf32>
    %28 = vector.broadcast %27 : vector<1x1xf32> to vector<1x8xf32>
    %29 = arith.addf %26, %28 : vector<1x8xf32>
    %c0_23 = arith.constant 0 : index
    %c0_24 = arith.constant 0 : index
    %30 = vector.load %arg10[%c0_23, %c0_24] : memref<1x8xf32, #tpu.memory_space<vmem>>, vector<1x8xf32>
    tpu.vector_store %arg10[%c0_23, %c0_24], %29 {strides = array<i32>} : memref<1x8xf32, #tpu.memory_space<vmem>>, vector<1x8xf32>,
    return
  }
  func.func @transform_0(%arg0: i32) -> (i32, i32) {
    %c0_i32 = arith.constant 0 : i32
    %c0_i32_0 = arith.constant 0 : i32
    return %arg0, %c0_i32 : i32, i32
  }
  func.func @transform_1(%arg0: i32) -> (i32, i32) {
    %c0_i32 = arith.constant 0 : i32
    %c0_i32_0 = arith.constant 0 : i32
    %c0_i32_1 = arith.constant 0 : i32
    return %c0_i32, %c0_i32_0 : i32, i32
  }
  func.func @transform_2(%arg0: i32) -> (i32, i32) {
    %c0_i32 = arith.constant 0 : i32
    %c0_i32_0 = arith.constant 0 : i32
    %c0_i32_1 = arith.constant 0 : i32
    return %c0_i32, %c0_i32_0 : i32, i32
  }
  func.func @transform_3(%arg0: i32) -> (i32, i32) {
    %c0_i32 = arith.constant 0 : i32
    %c0_i32_0 = arith.constant 0 : i32
    %c0_i32_1 = arith.constant 0 : i32
    return %c0_i32, %c0_i32_0 : i32, i32
  }
  func.func @transform_4(%arg0: i32) -> (i32, i32) {
    %c0_i32 = arith.constant 0 : i32
    %c0_i32_0 = arith.constant 0 : i32
    %c0_i32_1 = arith.constant 0 : i32
    return %c0_i32, %c0_i32_0 : i32, i32
  }
  func.func @transform_5(%arg0: i32) -> (i32, i32) {
    %c0_i32 = arith.constant 0 : i32
    %c0_i32_0 = arith.constant 0 : i32
    %c0_i32_1 = arith.constant 0 : i32
    return %c0_i32, %c0_i32_0 : i32, i32
  }
  func.func @transform_6(%arg0: i32) -> (i32, i32) {
    %c0_i32 = arith.constant 0 : i32
    %c0_i32_0 = arith.constant 0 : i32
    %c0_i32_1 = arith.constant 0 : i32
    return %c0_i32, %c0_i32_0 : i32, i32
  }
  func.func @transform_7(%arg0: i32) -> (i32, i32) {
    %c0_i32 = arith.constant 0 : i32
    %c0_i32_0 = arith.constant 0 : i32
    %c0_i32_1 = arith.constant 0 : i32
    return %c0_i32, %c0_i32_0 : i32, i32
  }
  func.func @transform_8(%arg0: i32) -> (i32, i32) {
    %c0_i32 = arith.constant 0 : i32
    %c0_i32_0 = arith.constant 0 : i32
    %c0_i32_1 = arith.constant 0 : i32
    return %c0_i32, %c0_i32_0 : i32, i32
  }
  func.func @transform_9(%arg0: i32) -> (i32, i32) {
    %c0_i32 = arith.constant 0 : i32
    %c0_i32_0 = arith.constant 0 : i32
    return %c0_i32, %arg0 : i32, i32
  }
}

</mosaic_0001>

<bundles_post_ra>
// kernel: tpu_custom_call.1
= control target key start
LH: loop header
LB: loop body
LE: loop exit
PB: predicated region body
PF: predicated region fallthrough
CT: control target
= control target key end

     0   :  { %s973_s0 = inlined_call_operand.hbm [shape: f32[8,16], index: 0, kind: input, shape index: {}]   ;;  %s974_s1 = inlined_call_operand.hbm [shape: f32[16,128], index: 1, kind: input, shape index: {}]   ;;  %s975_s2 = inlined_call_operand.vmem [shape: f32[1,128], index: 2, kind: input, shape index: {}]   ;;  %s976_s3 = inlined_call_operand.hbm [shape: f32[128,512], index: 3, kind: input, shape index: {}]   ;;  %s977_s4 = inlined_call_operand.vmem [shape: f32[1,512], index: 4, kind: input, shape index: {}]   ;;  %s978_s5 = inlined_call_operand.hbm [shape: f32[512,128], index: 5, kind: input, shape index: {}]   ;;  %s979_s6 = inlined_call_operand.vmem [shape: f32[1,128], index: 6, kind: input, shape index: {}]   ;;  %s980_s7 = inlined_call_operand.vmem [shape: f32[1,128], index: 7, kind: input, shape index: {}]   ;;  %s981_s8 = inlined_call_operand.<no memory space> [shape: f32[1,1], index: 8, kind: input, shape index: {}]   ;;  %s982_s9 = inlined_call_operand.hbm [shape: f32[1,8], index: 9, kind: output, shape index: {}]  }
   0x1   :  { %v14_v0 = vstv %s981_s8 }
   0x2   :  { %15 = vst [vmem:[#allocation2] sm:$0x1] %v14_v0 }
   0x3   :  { %16 = vsyncpa [#allocation4], 0 }
   0x4   :  { %17 = vsyncpa [#allocation7], 0 }
   0x5   :  { %18 = vsyncpa [#allocation10], 0 }
   0x6   :  { %19 = vsyncpa [#allocation5], 0  ;;  %s870_s11 = smov [#allocation6]  }
   0x7   :  { %s35_s12 = sshll.u32 %s870_s11, 4  ;;  %s36_s12 = int_to_ptr.vmem [resolvable:$true] %s35_s12 }
   0x8   :  { %s770_s13 = scalar_lea.vmem %s36_s12, 256  ;;  %p775_p1 = scmp.lt.s32.totalorder %s36_s12, %s36_s12 }
   0x9   :  { %p771_p0 = scmp.ne.s32.totalorder %s36_s12, %s770_s13  ;;  %p776_p2 = scmp.lt.s32.totalorder %s770_s13, %s770_s13 }
   0xb   :  { %p777_p3 = por %p776_p2, %p775_p1 }
   0xd   :  { %p778_p4 = pnand %p777_p3, %p771_p0 }
   0xf   :  { %781 = shalt.err (!%p778_p4)
}
  0x10   :  { %s871_s14 = smov 128   ;;  %s872_s15 = smov 8  }
  0x11   :  { %41 = dma.hbm_to_vmem [thread:$0]  %s974_s1, 256, %s36_s12, [#allocation7], %s871_s14, %s871_s14, %s872_s15  }
  0x12   :  { %s873_s17 = smov [#allocation3]   ;;  %s874_s19 = smov [#allocation8]  }
  0x13   :  { %s26_s18 = sshll.u32 %s873_s17, 4  ;;  %s49_s20 = sshll.u32 %s874_s19, 4  ;;  %s27_s18 = int_to_ptr.vmem [resolvable:$true] %s26_s18  ;;  %s50_s20 = int_to_ptr.vmem [resolvable:$true] %s49_s20 }
  0x14   :  { %s790_s21 = scalar_lea.vmem %s27_s18, 128  ;;  %p795_p6 = scmp.lt.s32.totalorder %s27_s18, %s27_s18 }
  0x15   :  { %p791_p5 = scmp.ne.s32.totalorder %s27_s18, %s790_s21  ;;  %p796_p7 = scmp.lt.s32.totalorder %s790_s21, %s790_s21 }
  0x17   :  { %p797_p8 = por %p796_p7, %p795_p6 }
  0x19   :  { %p798_p9 = pnand %p797_p8, %p791_p5 }
  0x1b   :  { %801 = shalt.err (!%p798_p9)
}
  0x1c   :  { %29 = dma.hbm_to_vmem [thread:$0]  %s973_s0, 128, %s27_s18, [#allocation4]  }
  0x1d   :  { %s810_s24 = scalar_lea.vmem %s50_s20, 8192  ;;  %p815_p11 = scmp.lt.s32.totalorder %s50_s20, %s50_s20 }
  0x1e   :  { %p811_p10 = scmp.ne.s32.totalorder %s50_s20, %s810_s24  ;;  %p816_p12 = scmp.lt.s32.totalorder %s810_s24, %s810_s24 }
  0x20   :  { %p817_p13 = por %p816_p12, %p815_p11 }
  0x22   :  { %p818_p0 = pnand %p817_p13, %p811_p10 }
  0x24   :  { %821 = shalt.err (!%p818_p0)
}
  0x25   :  { %s875_s1 = smov 512   ;;  %s876_s25 = smov 32  }
  0x26   :  { %55 = dma.hbm_to_vmem [thread:$0]  %s976_s3, 8192, %s50_s20, [#allocation7], %s875_s1, %s875_s1, %s876_s25  }
  0x27   :  { %s877_s28 = smov [#allocation9]  }
  0x28   :  { %s63_s29 = sshll.u32 %s877_s28, 4  ;;  %s64_s29 = int_to_ptr.vmem [resolvable:$true] %s63_s29 }
  0x29   :  { %s830_s30 = scalar_lea.vmem %s64_s29, 8192  ;;  %p835_p2 = scmp.lt.s32.totalorder %s64_s29, %s64_s29 }
  0x2a   :  { %p831_p1 = scmp.ne.s32.totalorder %s64_s29, %s830_s30  ;;  %p836_p3 = scmp.lt.s32.totalorder %s830_s30, %s830_s30 }
  0x2c   :  { %p837_p4 = por %p836_p3, %p835_p2 }
  0x2e   :  { %p838_p5 = pnand %p837_p4, %p831_p1 }
  0x30   :  { %841 = shalt.err (!%p838_p5)
}
  0x31   :  { %69 = dma.hbm_to_vmem [thread:$0]  %s978_s5, 8192, %s64_s29, [#allocation10], %s871_s14, %s871_s14, %s872_s15  }
  0x32   :  { %862 = dma.done.wait [#allocation4], 128  }
  0x33   :  { %863 = vsyncadd [#allocation4], 4294967168 }
  0x34   :  { %864 = dma.done.wait [#allocation7], 8448  }
  0x35   :  { %865 = vsyncadd [#allocation7], 4294958848 }
  0x36   :  { %866 = dma.done.wait [#allocation10], 8192  }
  0x37   :  { %867 = vsyncadd [#allocation10], 4294959104  ;;  %v878_v1 = vmov 0.0   ;;  %vm879_vm0 = vmmov 0   ;;  %v90_v2 = vld [vmem:[#allocation6 + $0x8] sm:$0xff]  ;;  %v89_v3 = vld [vmem:[#allocation6] sm:$0xff] }
  0x38   :  { %742 = vmatprep.subr.mxu0 %v878_v1  ;;  %746 = vmatprep.mubr.msk.f32.mxu0 %vm879_vm0, %v878_v1  ;;  %v88_v4 = vld [vmem:[#allocation3] sm:$0xff]  ;;  %vm98_vm1 = vcmask 130048   ;;  %v236_v6 = vld [vmem:[#allocation8 + $0x1f8] sm:$0xff]  ;;  %v233_v7 = vld [vmem:[#allocation8 + $0x1e0] sm:$0xff]  ;;  %vm646_vm2 = vcmask 57344  }
  0x39   :  { %323 = vmatprep.mubr.f32.mxu1 %v878_v1  ;;  %743 = vmatpush3.msra.mxu0 %v90_v2  ;;  %v234_v5 = vld [vmem:[#allocation8 + $0x1e8] sm:$0xff]  ;;  %v235_v8 = vld [vmem:[#allocation8 + $0x1f0] sm:$0xff]  ;;  %v232_v10 = vld [vmem:[#allocation8 + $0x1d8] sm:$0xff] }
  0x3a   :  { %744 = vmatprep.subr.mxu0 %v878_v1  ;;  %259 = vmatprep.subr.mxu1 %v234_v5  ;;  %v230_v9 = vld [vmem:[#allocation8 + $0x1c8] sm:$0xff]  ;;  %v229_v11 = vld [vmem:[#allocation8 + $0x1c0] sm:$0xff]  ;;  %v231_v12 = vld [vmem:[#allocation8 + $0x1d0] sm:$0xff] }
  0x3b   :  { %745 = vmatpush3.msra.mxu0 %v89_v3  ;;  %260 = vmatpush1.msra.mxu1 %v233_v7  ;;  %v226_v13 = vld [vmem:[#allocation8 + $0x1a8] sm:$0xff]  ;;  %v228_v14 = vld [vmem:[#allocation8 + $0x1b8] sm:$0xff]  ;;  %v225_v15 = vld [vmem:[#allocation8 + $0x1a0] sm:$0xff] }
  0x3c   :  { %747 = vmatmul.mubr.msk.f32.vlgmr.msra.gmra.mxu0 %vm98_vm1, %v88_v4  ;;  %330 = vmatprep.subr.mxu0 %v236_v6  ;;  %v227_v16 = vld [vmem:[#allocation8 + $0x1b0] sm:$0xff]  ;;  %v222_v17 = vld [vmem:[#allocation8 + $0x188] sm:$0xff]  ;;  %v224_v18 = vld [vmem:[#allocation8 + $0x198] sm:$0xff] }
  0x3d   :  { %331 = vmatpush1.msra.mxu0 %v235_v8  ;;  %261 = vmatprep.subr.mxu1 %v230_v9  ;;  %v221_v19 = vld [vmem:[#allocation8 + $0x180] sm:$0xff]  ;;  %v223_v20 = vld [vmem:[#allocation8 + $0x190] sm:$0xff]  ;;  %v218_v21 = vld [vmem:[#allocation8 + $0x168] sm:$0xff] }
  0x3e   :  { %332 = vmatprep.subr.mxu0 %v232_v10  ;;  %262 = vmatpush1.msra.mxu1 %v229_v11  ;;  %v220_v22 = vld [vmem:[#allocation8 + $0x178] sm:$0xff]  ;;  %v217_v23 = vld [vmem:[#allocation8 + $0x160] sm:$0xff]  ;;  %v219_v24 = vld [vmem:[#allocation8 + $0x170] sm:$0xff] }
  0x3f   :  { %333 = vmatpush1.msra.mxu0 %v231_v12  ;;  %263 = vmatprep.subr.mxu1 %v226_v13  ;;  %v214_v25 = vld [vmem:[#allocation8 + $0x148] sm:$0xff]  ;;  %v216_v26 = vld [vmem:[#allocation8 + $0x158] sm:$0xff]  ;;  %v213_v27 = vld [vmem:[#allocation8 + $0x140] sm:$0xff] }
  0x40   :  { %334 = vmatprep.subr.mxu0 %v228_v14  ;;  %264 = vmatpush1.msra.mxu1 %v225_v15  ;;  %v215_v28 = vld [vmem:[#allocation8 + $0x150] sm:$0xff]  ;;  %v210_v29 = vld [vmem:[#allocation8 + $0x128] sm:$0xff]  ;;  %v212_v30 = vld [vmem:[#allocation8 + $0x138] sm:$0xff] }
  0x41   :  { %335 = vmatpush1.msra.mxu0 %v227_v16  ;;  %265 = vmatprep.subr.mxu1 %v222_v17  ;;  %v209_v31 = vld [vmem:[#allocation8 + $0x120] sm:$0xff]  ;;  %v211_v32 = vld [vmem:[#allocation8 + $0x130] sm:$0xff]  ;;  %v206_v33 = vld [vmem:[#allocation8 + $0x108] sm:$0xff] }
  0x42   :  { %336 = vmatprep.subr.mxu0 %v224_v18  ;;  %266 = vmatpush1.msra.mxu1 %v221_v19  ;;  %v208_v34 = vld [vmem:[#allocation8 + $0x118] sm:$0xff]  ;;  %v205_v35 = vld [vmem:[#allocation8 + $0x100] sm:$0xff]  ;;  %v207_v36 = vld [vmem:[#allocation8 + $0x110] sm:$0xff] }
  0x43   :  { %337 = vmatpush1.msra.mxu0 %v223_v20  ;;  %267 = vmatprep.subr.mxu1 %v218_v21  ;;  %v202_v37 = vld [vmem:[#allocation8 + $0xe8] sm:$0xff]  ;;  %v204_v38 = vld [vmem:[#allocation8 + $0xf8] sm:$0xff]  ;;  %v201_v39 = vld [vmem:[#allocation8 + $0xe0] sm:$0xff] }
  0x44   :  { %338 = vmatprep.subr.mxu0 %v220_v22  ;;  %268 = vmatpush1.msra.mxu1 %v217_v23  ;;  %v203_v40 = vld [vmem:[#allocation8 + $0xf0] sm:$0xff]  ;;  %v198_v41 = vld [vmem:[#allocation8 + $0xc8] sm:$0xff]  ;;  %v200_v42 = vld [vmem:[#allocation8 + $0xd8] sm:$0xff] }
  0x45   :  { %339 = vmatpush1.msra.mxu0 %v219_v24  ;;  %269 = vmatprep.subr.mxu1 %v214_v25  ;;  %v197_v43 = vld [vmem:[#allocation8 + $0xc0] sm:$0xff]  ;;  %v199_v44 = vld [vmem:[#allocation8 + $0xd0] sm:$0xff]  ;;  %v194_v45 = vld [vmem:[#allocation8 + $0xa8] sm:$0xff] }
  0x46   :  { %340 = vmatprep.subr.mxu0 %v216_v26  ;;  %270 = vmatpush1.msra.mxu1 %v213_v27  ;;  %v196_v46 = vld [vmem:[#allocation8 + $0xb8] sm:$0xff]  ;;  %v193_v47 = vld [vmem:[#allocation8 + $0xa0] sm:$0xff]  ;;  %v195_v48 = vld [vmem:[#allocation8 + $0xb0] sm:$0xff] }
  0x47   :  { %341 = vmatpush1.msra.mxu0 %v215_v28  ;;  %271 = vmatprep.subr.mxu1 %v210_v29  ;;  %v190_v49 = vld [vmem:[#allocation8 + $0x88] sm:$0xff]  ;;  %v192_v50 = vld [vmem:[#allocation8 + $0x98] sm:$0xff]  ;;  %v189_v51 = vld [vmem:[#allocation8 + $0x80] sm:$0xff] }
  0x48   :  { %342 = vmatprep.subr.mxu0 %v212_v30  ;;  %272 = vmatpush1.msra.mxu1 %v209_v31  ;;  %v191_v52 = vld [vmem:[#allocation8 + $0x90] sm:$0xff]  ;;  %v186_v53 = vld [vmem:[#allocation8 + $0x68] sm:$0xff]  ;;  %v188_v54 = vld [vmem:[#allocation8 + $0x78] sm:$0xff] }
  0x49   :  { %343 = vmatpush1.msra.mxu0 %v211_v32  ;;  %273 = vmatprep.subr.mxu1 %v206_v33  ;;  %v185_v55 = vld [vmem:[#allocation8 + $0x60] sm:$0xff]  ;;  %v187_v56 = vld [vmem:[#allocation8 + $0x70] sm:$0xff]  ;;  %v182_v57 = vld [vmem:[#allocation8 + $0x48] sm:$0xff] }
  0x4a   :  { %344 = vmatprep.subr.mxu0 %v208_v34  ;;  %274 = vmatpush1.msra.mxu1 %v205_v35  ;;  %v184_v58 = vld [vmem:[#allocation8 + $0x58] sm:$0xff]  ;;  %v181_v59 = vld [vmem:[#allocation8 + $0x40] sm:$0xff]  ;;  %v183_v60 = vld [vmem:[#allocation8 + $0x50] sm:$0xff] }
  0x4b   :  { %345 = vmatpush1.msra.mxu0 %v207_v36  ;;  %275 = vmatprep.subr.mxu1 %v202_v37  ;;  %v178_v61 = vld [vmem:[#allocation8 + $0x28] sm:$0xff]  ;;  %v180_v62 = vld [vmem:[#allocation8 + $0x38] sm:$0xff]  ;;  %v177_v63 = vld [vmem:[#allocation8 + $0x20] sm:$0xff] }
  0x4c   :  { %346 = vmatprep.subr.mxu0 %v204_v38  ;;  %276 = vmatpush1.msra.mxu1 %v201_v39  ;;  %v179_v0 = vld [vmem:[#allocation8 + $0x30] sm:$0xff]  ;;  %v174_v2 = vld [vmem:[#allocation8 + $0x8] sm:$0xff]  ;;  %v176_v3 = vld [vmem:[#allocation8 + $0x18] sm:$0xff] }
  0x4d   :  { %347 = vmatpush1.msra.mxu0 %v203_v40  ;;  %277 = vmatprep.subr.mxu1 %v198_v41  ;;  %v173_v4 = vld [vmem:[#allocation8] sm:$0xff]  ;;  %v175_v5 = vld [vmem:[#allocation8 + $0x10] sm:$0xff]  ;;  %v468_v6 = vld [vmem:[#allocation9 + $0x1f8] sm:$0xff] }
  0x4e   :  { %348 = vmatprep.subr.mxu0 %v200_v42  ;;  %278 = vmatpush1.msra.mxu1 %v197_v43  ;;  %v665_v7 = vld [vmem:[%s975_s2] ss:$0 sm:$0xff]  ;;  %v420_v12 = vld [vmem:[#allocation9 + $0x78] sm:$0xff]  ;;  %v435_v14 = vld [vmem:[#allocation9 + $0xf0] sm:$0xff] }
  0x4f   :  { %349 = vmatpush1.msra.mxu0 %v199_v44  ;;  %279 = vmatprep.subr.mxu1 %v194_v45  ;;  %v452_v13 = vld [vmem:[#allocation9 + $0x178] sm:$0xff]  ;;  %v467_v15 = vld [vmem:[#allocation9 + $0x1f0] sm:$0xff]  ;;  %v434_v18 = vld [vmem:[#allocation9 + $0xe8] sm:$0xff] }
  0x50   :  { %350 = vmatprep.subr.mxu0 %v196_v46  ;;  %280 = vmatpush1.msra.mxu1 %v193_v47  ;;  %v419_v16 = vld [vmem:[#allocation9 + $0x70] sm:$0xff]  ;;  %v466_v19 = vld [vmem:[#allocation9 + $0x1e8] sm:$0xff]  ;;  %v433_v22 = vld [vmem:[#allocation9 + $0xe0] sm:$0xff] }
  0x51   :  { %351 = vmatpush1.msra.mxu0 %v195_v48  ;;  %281 = vmatprep.subr.mxu1 %v190_v49  ;;  %v451_v17 = vld [vmem:[#allocation9 + $0x170] sm:$0xff]  ;;  %v418_v20 = vld [vmem:[#allocation9 + $0x68] sm:$0xff]  ;;  %v465_v23 = vld [vmem:[#allocation9 + $0x1e0] sm:$0xff] }
  0x52   :  { %352 = vmatprep.subr.mxu0 %v192_v50  ;;  %282 = vmatpush1.msra.mxu1 %v189_v51  ;;  %v450_v21 = vld [vmem:[#allocation9 + $0x168] sm:$0xff]  ;;  %v417_v24 = vld [vmem:[#allocation9 + $0x60] sm:$0xff]  ;;  %v432_v26 = vld [vmem:[#allocation9 + $0xd8] sm:$0xff] }
  0x53   :  { %353 = vmatpush1.msra.mxu0 %v191_v52  ;;  %283 = vmatprep.subr.mxu1 %v186_v53  ;;  %v449_v25 = vld [vmem:[#allocation9 + $0x160] sm:$0xff]  ;;  %v464_v27 = vld [vmem:[#allocation9 + $0x1d8] sm:$0xff]  ;;  %v431_v30 = vld [vmem:[#allocation9 + $0xd0] sm:$0xff] }
  0x54   :  { %354 = vmatprep.subr.mxu0 %v188_v54  ;;  %284 = vmatpush1.msra.mxu1 %v185_v55  ;;  %v416_v28 = vld [vmem:[#allocation9 + $0x58] sm:$0xff]  ;;  %v463_v31 = vld [vmem:[#allocation9 + $0x1d0] sm:$0xff]  ;;  %v430_v34 = vld [vmem:[#allocation9 + $0xc8] sm:$0xff] }
  0x55   :  { %355 = vmatpush1.msra.mxu0 %v187_v56  ;;  %285 = vmatprep.subr.mxu1 %v182_v57  ;;  %v448_v29 = vld [vmem:[#allocation9 + $0x158] sm:$0xff]  ;;  %v415_v32 = vld [vmem:[#allocation9 + $0x50] sm:$0xff]  ;;  %v462_v35 = vld [vmem:[#allocation9 + $0x1c8] sm:$0xff] }
  0x56   :  { %356 = vmatprep.subr.mxu0 %v184_v58  ;;  %394 = vmatprep.mubr.f32.mxu0 %v878_v1  ;;  %v436_v1 = vld [vmem:[#allocation9 + $0xf8] sm:$0xff]  ;;  %v447_v33 = vld [vmem:[#allocation9 + $0x150] sm:$0xff]  ;;  %v414_v36 = vld [vmem:[#allocation9 + $0x48] sm:$0xff] }
  0x57   :  { %286 = vmatpush1.msra.mxu1 %v181_v59  ;;  %357 = vmatpush1.msra.mxu0 %v183_v60  ;;  %v446_v37 = vld [vmem:[#allocation9 + $0x148] sm:$0xff]  ;;  %v429_v38 = vld [vmem:[#allocation9 + $0xc0] sm:$0xff]  ;;  %v428_v42 = vld [vmem:[#allocation9 + $0xb8] sm:$0xff] }
  0x58   :  { %287 = vmatprep.subr.mxu1 %v178_v61  ;;  %358 = vmatprep.subr.mxu0 %v180_v62  ;;  %v461_v39 = vld [vmem:[#allocation9 + $0x1c0] sm:$0xff]  ;;  %v460_v43 = vld [vmem:[#allocation9 + $0x1b8] sm:$0xff]  ;;  %v427_v46 = vld [vmem:[#allocation9 + $0xb0] sm:$0xff] }
  0x59   :  { %288 = vmatpush1.msra.mxu1 %v177_v63  ;;  %359 = vmatpush1.msra.mxu0 %v179_v0  ;;  %v413_v40 = vld [vmem:[#allocation9 + $0x40] sm:$0xff]  ;;  %v412_v44 = vld [vmem:[#allocation9 + $0x38] sm:$0xff]  ;;  %v459_v47 = vld [vmem:[#allocation9 + $0x1b0] sm:$0xff] }
  0x5a   :  { %289 = vmatprep.subr.mxu1 %v174_v2  ;;  %360 = vmatprep.subr.mxu0 %v176_v3  ;;  %v445_v41 = vld [vmem:[#allocation9 + $0x140] sm:$0xff]  ;;  %v444_v45 = vld [vmem:[#allocation9 + $0x138] sm:$0xff]  ;;  %v411_v48 = vld [vmem:[#allocation9 + $0x30] sm:$0xff] }
  0x5b   :  { %290 = vmatpush1.msra.mxu1 %v173_v4  ;;  %361 = vmatpush1.msra.mxu0 %v175_v5  ;;  %v443_v49 = vld [vmem:[#allocation9 + $0x130] sm:$0xff]  ;;  %v426_v50 = vld [vmem:[#allocation9 + $0xa8] sm:$0xff]  ;;  %v425_v54 = vld [vmem:[#allocation9 + $0xa0] sm:$0xff] }
  0x5c   :  { %672 = vmatprep.subr.mxu1 %v436_v1  ;;  %707 = vmatprep.subr.mxu0 %v468_v6  ;;  %v458_v51 = vld [vmem:[#allocation9 + $0x1a8] sm:$0xff]  ;;  %v457_v55 = vld [vmem:[#allocation9 + $0x1a0] sm:$0xff]  ;;  %v424_v58 = vld [vmem:[#allocation9 + $0x98] sm:$0xff] }
  0x5d   :  { %v410_v52 = vld [vmem:[#allocation9 + $0x28] sm:$0xff]  ;;  %v409_v56 = vld [vmem:[#allocation9 + $0x20] sm:$0xff]  ;;  %v456_v59 = vld [vmem:[#allocation9 + $0x198] sm:$0xff] }
  0x5e   :  { %v442_v53 = vld [vmem:[#allocation9 + $0x128] sm:$0xff]  ;;  %v441_v57 = vld [vmem:[#allocation9 + $0x120] sm:$0xff]  ;;  %v408_v60 = vld [vmem:[#allocation9 + $0x18] sm:$0xff] }
  0x5f   :  { %v440_v61 = vld [vmem:[#allocation9 + $0x118] sm:$0xff]  ;;  %v423_v62 = vld [vmem:[#allocation9 + $0x90] sm:$0xff]  ;;  %v422_v3 = vld [vmem:[#allocation9 + $0x88] sm:$0xff] }
  0x60   :  { %v455_v63 = vld [vmem:[#allocation9 + $0x190] sm:$0xff]  ;;  %v454_v4 = vld [vmem:[#allocation9 + $0x188] sm:$0xff]  ;;  %v421_v6 = vld [vmem:[#allocation9 + $0x80] sm:$0xff] }
  0x61   :  { %v407_v0 = vld [vmem:[#allocation9 + $0x10] sm:$0xff]  ;;  %v406_v5 = vld [vmem:[#allocation9 + $0x8] sm:$0xff] }
  0x62   :  { %v439_v2 = vld [vmem:[#allocation9 + $0x110] sm:$0xff]  ;;  %v438_v1 = vld [vmem:[#allocation9 + $0x108] sm:$0xff] }
  0xfc   :  { %v168_v8 = vpop.f32.mrf.mxu0 }
  0xfd   :  { %v169_v9 = vadd.f32 %v665_v7, %v168_v8  ;;  %v453_v7 = vld [vmem:[#allocation9 + $0x180] sm:$0xff] }
  0xfe   :  { %v748_v10 = vpop.f32.mrf.mxu0  ;;  %v405_v8 = vld [vmem:[#allocation9] sm:$0xff] }
  0xff   :  { %v172_v11 = vmax.f32 %v169_v9, 0.0  ;;  %v437_v9 = vld [vmem:[#allocation9 + $0x100] sm:$0xff]  ;;  %v239_v10 = vlaneseq }
 0x101   :  { %324 = vmatmul.mubr.f32.vlgmr.msra.gmra.mxu1 %v172_v11  ;;  %395 = vmatmul.mubr.f32.vlgmr.msra.gmra.mxu0 %v172_v11  ;;  %v240_v11 = vshrl.u32 %v239_v10, 7 }
 0x102   :  { %673 = vmatpush3.msra.mxu1 %v420_v12  ;;  %708 = vmatpush3.msra.mxu0 %v452_v13 }
 0x103   :  { %674 = vmatprep.subr.mxu1 %v435_v14  ;;  %709 = vmatprep.subr.mxu0 %v467_v15  ;;  %v241_v12 = vsub.s32 0, %v240_v11  ;;  %v249_v13 = vsub.s32 2, %v240_v11  ;;  %v237_v14 = vld [vmem:[%s977_s4] sm:$0xf]  ;;  %v245_v15 = vsub.s32 1, %v240_v11 }
 0x104   :  { %675 = vmatpush3.msra.mxu1 %v419_v16  ;;  %710 = vmatpush3.msra.mxu0 %v451_v17  ;;  %v253_v16 = vsub.s32 3, %v240_v11 }
 0x105   :  { %676 = vmatprep.subr.mxu1 %v434_v18  ;;  %711 = vmatprep.subr.mxu0 %v466_v19  ;;  %v242_v17 = vrot.slane %v237_v14, %v241_v12  ;;  %v250_v18 = vrot.slane %v237_v14, %v249_v13  ;;  %v246_v19 = vrot.slane %v237_v14, %v245_v15 }
 0x106   :  { %677 = vmatpush3.msra.mxu1 %v418_v20  ;;  %712 = vmatpush3.msra.mxu0 %v450_v21  ;;  %v254_v20 = vrot.slane %v237_v14, %v253_v16 }
 0x107   :  { %678 = vmatprep.subr.mxu1 %v433_v22  ;;  %713 = vmatprep.subr.mxu0 %v465_v23 }
 0x108   :  { %679 = vmatpush3.msra.mxu1 %v417_v24  ;;  %714 = vmatpush3.msra.mxu0 %v449_v25 }
 0x109   :  { %680 = vmatprep.subr.mxu1 %v432_v26  ;;  %715 = vmatprep.subr.mxu0 %v464_v27 }
 0x10a   :  { %681 = vmatpush3.msra.mxu1 %v416_v28  ;;  %716 = vmatpush3.msra.mxu0 %v448_v29 }
 0x10b   :  { %682 = vmatprep.subr.mxu1 %v431_v30  ;;  %717 = vmatprep.subr.mxu0 %v463_v31 }
 0x10c   :  { %683 = vmatpush3.msra.mxu1 %v415_v32  ;;  %718 = vmatpush3.msra.mxu0 %v447_v33  ;;  %v880_v33 = vmov 0  }
 0x10d   :  { %684 = vmatprep.subr.mxu1 %v430_v34  ;;  %719 = vmatprep.subr.mxu0 %v462_v35 }
 0x10e   :  { %685 = vmatpush3.msra.mxu1 %v414_v36  ;;  %720 = vmatpush3.msra.mxu0 %v446_v37  ;;  %v667_v36 = vld [vmem:[%s979_s6] ss:$0 sm:$0xff]  ;;  %s881_s6 = smov [#allocation11]  }
 0x10f   :  { %686 = vmatprep.subr.mxu1 %v429_v38  ;;  %721 = vmatprep.subr.mxu0 %v461_v39  ;;  %s654_s15 = sshll.u32 %s881_s6, 4  ;;  %s655_s15 = int_to_ptr.vmem [resolvable:$true] %s654_s15 }
 0x110   :  { %687 = vmatpush3.msra.mxu1 %v413_v40  ;;  %722 = vmatpush3.msra.mxu0 %v445_v41  ;;  %s842_s8 = scalar_lea.vmem %s655_s15, 16  ;;  %p847_p7 = scmp.lt.s32.totalorder %s655_s15, %s655_s15 }
 0x111   :  { %688 = vmatprep.subr.mxu1 %v428_v42  ;;  %723 = vmatprep.subr.mxu0 %v460_v43  ;;  %v668_v43 = vld [vmem:[%s980_s7] ss:$0 sm:$0xff]  ;;  %p843_p6 = scmp.ne.s32.totalorder %s655_s15, %s842_s8  ;;  %s846_s7 = scalar_lea.vmem %s655_s15, 32 }
 0x112   :  { %689 = vmatpush3.msra.mxu1 %v412_v44  ;;  %724 = vmatpush3.msra.mxu0 %v444_v45  ;;  %p848_p8 = scmp.lt.s32.totalorder %s846_s7, %s842_s8 }
 0x113   :  { %690 = vmatprep.subr.mxu1 %v427_v46  ;;  %725 = vmatprep.subr.mxu0 %v459_v47  ;;  %v627_v46 = vld [vmem:[#allocation2] sm:$0x1] }
 0x114   :  { %691 = vmatpush3.msra.mxu1 %v411_v48  ;;  %726 = vmatpush3.msra.mxu0 %v443_v49  ;;  %v640_v48 = vand.u32 127, %v239_v10  ;;  %p849_p9 = por %p848_p8, %p847_p7 }
 0x115   :  { %692 = vmatprep.subr.mxu1 %v426_v50  ;;  %727 = vmatprep.subr.mxu0 %v458_v51 }
 0x116   :  { %693 = vmatpush3.msra.mxu1 %v410_v52  ;;  %728 = vmatpush3.msra.mxu0 %v442_v53  ;;  %v643_v50 = vsub.s32 %v640_v48, %v240_v11  ;;  %p850_p10 = pnand %p849_p9, %p843_p6 }
 0x117   :  { %694 = vmatprep.subr.mxu1 %v425_v54  ;;  %729 = vmatprep.subr.mxu0 %v457_v55 }
 0x118   :  { %695 = vmatpush3.msra.mxu1 %v409_v56  ;;  %730 = vmatpush3.msra.mxu0 %v441_v57 }
 0x119   :  { %696 = vmatprep.subr.mxu1 %v424_v58  ;;  %731 = vmatprep.subr.mxu0 %v456_v59 }
 0x11a   :  { %697 = vmatpush3.msra.mxu1 %v408_v60  ;;  %732 = vmatpush3.msra.mxu0 %v440_v61 }
 0x11b   :  { %698 = vmatprep.subr.mxu1 %v423_v62  ;;  %733 = vmatprep.subr.mxu0 %v455_v63 }
 0x11c   :  { %699 = vmatpush3.msra.mxu1 %v407_v0  ;;  %734 = vmatpush3.msra.mxu0 %v439_v2 }
 0x11d   :  { %700 = vmatprep.subr.mxu1 %v422_v3  ;;  %735 = vmatprep.subr.mxu0 %v454_v4 }
 0x11e   :  { %701 = vmatpush3.msra.mxu1 %v406_v5  ;;  %736 = vmatpush3.msra.mxu0 %v438_v1 }
 0x11f   :  { %702 = vmatprep.subr.mxu1 %v421_v6  ;;  %737 = vmatprep.subr.mxu0 %v453_v7 }
 0x120   :  { %703 = vmatpush3.msra.mxu1 %v405_v8  ;;  %738 = vmatpush3.msra.mxu0 %v437_v9 }
 0x121   :  { %761 = vset.pattern.permute.xlu0 %v880_v33 }
 0x1c1   :  { %v325_v21 = vpop.f32.mrf.mxu1  ;;  %v396_v22 = vpop.f32.mrf.mxu0 }
 0x1c2   :  { %v326_v23 = vadd.f32 %v325_v21, %v242_v17  ;;  %v397_v24 = vadd.f32 %v396_v22, %v250_v18 }
 0x1c3   :  { %v327_v25 = vpop.f32.mrf.mxu1  ;;  %v398_v26 = vpop.f32.mrf.mxu0 }
 0x1c4   :  { %v328_v27 = vadd.f32 %v327_v25, %v246_v19  ;;  %v399_v28 = vadd.f32 %v398_v26, %v254_v20  ;;  %v401_v31 = vmax.f32 %v326_v23, 0.0  ;;  %v403_v32 = vmax.f32 %v397_v24, 0.0 }
 0x1c6   :  { %v402_v29 = vmax.f32 %v328_v27, 0.0  ;;  %v404_v30 = vmax.f32 %v399_v28, 0.0 }
 0x1c8   :  { %540 = vmatprep.mubr.f32.mxu1 %v402_v29  ;;  %610 = vmatprep.mubr.f32.mxu0 %v404_v30 }
 0x1c9   :  { %541 = vmatmul.mubr.f32.vlgmr.msra.gmra.mxu1 %v401_v31  ;;  %611 = vmatmul.mubr.f32.vlgmr.msra.gmra.mxu0 %v403_v32 }
 0x289   :  { %v704_v34 = vpop.f32.mrf.mxu1  ;;  %v739_v35 = vpop.f32.mrf.mxu0 }
 0x28b   :  { %v705_v37 = vpop.f32.mrf.mxu1  ;;  %v740_v38 = vpop.f32.mrf.mxu0 }
 0x28c   :  { %v706_v39 = vadd.f32 %v705_v37, %v704_v34  ;;  %v741_v41 = vadd.f32 %v740_v38, %v739_v35 }
 0x28e   :  { %v543_v40 = vadd.f32 %v706_v39, %v667_v36 }
 0x290   :  { %v613_v42 = vadd.f32 %v741_v41, %v543_v40 }
 0x292   :  { %v616_v44 = vmax.f32 %v613_v42, 0.0 }
 0x294   :  { %v624_v45 = vmul.f32 %v668_v43, %v616_v44 }
 0x296   :  { %625 = vadd.xlane.f32.xlu0 %v624_v45 }
 0x2ac   :  { %630 = vperm.xlu0 %761, %v627_v46  }
 0x31f   :  { %v626_v47 = vpop.xlane.xlu0 %625 }
 0x327   :  { %v631_v49 = vpop.permute.xlu0 %630 }
 0x328   :  { %v636_v51 = vrot.slane %v631_v49, %v241_v12 }
 0x32a   :  { %v637_v52 = vadd.f32 %v636_v51, %v626_v47 }
 0x32c   :  { %v644_v53 = vrot.slane %v637_v52, %v643_v50 }
 0x32e   :  { %647 = vst.msk [vmem:[#allocation11] sm:$0x1] %vm646_vm2, %v644_v53 }
 0x32f   :  { %853 = shalt.err (!%p850_p10)
}
 0x330   :  { %657 = dma.vmem_to_hbm [thread:$0]  %s655_s15, 16, %s982_s9, [#allocation5]  }
 0x331   :  { %868 = dma.done.wait [#allocation5], 16  }
 0x332   :  { %869 = vsyncadd [#allocation5], 4294967280 }
 0x333   :  { %661 = vsyncpa [#allocation4], 1 }
 0x334   :  { %662 = vsyncpa [#allocation7], 1 }
 0x335   :  { %663 = vsyncpa [#allocation10], 1 }
 0x336   :  { %664 = vsyncpa [#allocation5], 1 }

</bundles_post_ra>
